<compile_context>
chip_gen: v5e
topology: v5e:2x2
jax: 0.10.0
libtpu: 0.0.40
codegen_flags: <defaults>
</compile_context>

<pallas_src>
import jax
import jax.numpy as jnp
from jax.experimental import pallas as pl
from jax.experimental.pallas import tpu as pltpu


def _round_up(x, m):
    return ((x + m - 1) // m) * m


def _gelu_tanh(x):
    # PyTorch nn.functional.gelu(x, approximate='tanh'), computed in f32.
    c = 0.7978845608028654  # sqrt(2/pi)
    return 0.5 * x * (1.0 + jnp.tanh(c * (x + 0.044715 * x * x * x)))


# --------------------------------------------------------------------------
# Hardware-aware defaults
# --------------------------------------------------------------------------
def _tpu_params():
    """Returns (physical_vmem_bytes, num_tensorcores_per_chip, default_row_tile)."""
    kind = ""
    try:
        kind = jax.devices()[0].device_kind.lower()
    except Exception:
        pass
    is_v5e = ("v5 lite" in kind) or ("v5e" in kind) or ("v5litepod" in kind)
    is_v7 = "v7" in kind
    vmem_phys = (64 if is_v7 else 128) * 1024 * 1024
    try:
        vmem_phys = int(pltpu.get_tpu_info().vmem_capacity_bytes)
    except Exception:
        pass
    num_tc = 2 if is_v7 else 1
    # v5e: MXU/HBM break-even is ~tm>=240, so 256 is enough; v6e/v7x need
    # tm >= ~640-700 per core to be compute-bound -> 768 (multiple of 256).
    default_row_tile = 256 if is_v5e else 768
    return vmem_phys, num_tc, default_row_tile


def _inter_tile_options(i_pad, ti_max):
    """Descending list of k-tile sizes that divide i_pad (all multiples of 128)."""
    n128 = i_pad // 128
    opts = [
        i_pad // kt
        for kt in range(1, n128 + 1)
        if n128 % kt == 0 and (i_pad // kt) <= max(ti_max, 128)
    ]
    return opts or [128]


def _vmem_estimate(tm, ti, h, act_bytes, w_bytes):
    """Tile footprint: double-buffered blocks + f32 acc + f32 gelu intermediates."""
    dbl = 2 * (
        tm * h * act_bytes      # x block
        + h * ti * w_bytes      # W1 tile
        + ti * w_bytes          # b1 tile
        + ti * h * w_bytes      # W2 tile
        + h * w_bytes           # b2
        + tm * h * act_bytes    # out block
    )
    acc = 4 * tm * h                 # f32 accumulator scratch
    inter = 2 * 4 * tm * ti          # h and gelu(h) materialized in f32
    return dbl + acc + inter


def pad_siglip_mlp_weights(w1, b1, w2):
    """Pad the intermediate dim to a multiple of 128 ONCE (at model init).

    Exact: gelu(0) == 0 and the padded W2 rows are zero, so padded
    intermediate channels contribute nothing. Hoists the per-call jnp.pad of
    ~|W1|+|W2| bytes out of the forward path.
    """
    i = w1.shape[1]
    i_pad = _round_up(i, 128)
    if i_pad != i:
        w1 = jnp.pad(w1, ((0, 0), (0, i_pad - i)))
        b1 = jnp.pad(b1, ((0, 0), (0, i_pad - i)))
        w2 = jnp.pad(w2, ((0, i_pad - i), (0, 0)))
    return w1, b1, w2


# --------------------------------------------------------------------------
# Kernel
# --------------------------------------------------------------------------
def siglip_mlp_kernel(x_ref, w1_ref, b1_ref, w2_ref, b2_ref, o_ref, acc_ref):
    k = pl.program_id(1)

    @pl.when(k == 0)
    def _():
        acc_ref[...] = jnp.zeros_like(acc_ref)

    # fc1 partial over this intermediate tile; f32 accumulation on the MXU.
    h = jnp.dot(x_ref[...], w1_ref[...], preferred_element_type=jnp.float32)
    h = h + b1_ref[...].astype(jnp.float32)
    g = _gelu_tanh(h)

    # fc2 partial, accumulated over the intermediate (k) grid axis.
    acc_ref[...] += jnp.dot(
        g.astype(w2_ref.dtype), w2_ref[...], preferred_element_type=jnp.float32
    )

    @pl.when(k == pl.num_programs(1) - 1)
    def _():
        o_ref[...] = (acc_ref[...] + b2_ref[...].astype(jnp.float32)).astype(o_ref.dtype)


# --------------------------------------------------------------------------
# Wrapper
# --------------------------------------------------------------------------
def siglip_mlp(hidden_states, w1, b1, w2, b2, *, row_tile=None, inter_tile_max=2304):
    """SiglipMLP forward: fc2(gelu_tanh(fc1(x))).

    hidden_states: (B, S, H). w1: (H, I), b1: (1, I), w2: (I, H), b2: (1, H)
    (the transposed (in_features, out_features) form of nn.Linear weights).
    For best throughput pass bf16 activations/weights (accumulation stays f32
    inside the kernel) and pre-pad the weights once with
    pad_siglip_mlp_weights().
    """
    B, S, H = hidden_states.shape
    M = B * S
    x2d = hidden_states.reshape(M, H)

    vmem_phys, num_tc, default_row_tile = _tpu_params()
    if row_tile is None:
        row_tile = default_row_tile

    # ---- intermediate (I) tiling: pad only to a multiple of 128; k-tile ti
    # must divide the padded I. No per-call pad if weights were pre-padded.
    I = w1.shape[1]
    I_pad = _round_up(I, 128)
    if I_pad != I:
        # TODO(synk): callers should use pad_siglip_mlp_weights() at init to avoid this per-call copy.
        w1, b1, w2 = pad_siglip_mlp_weights(w1, b1, w2)
    ti_opts = _inter_tile_options(I_pad, inter_tile_max)

    # ---- row (M) tiling: big tiles (MXU-bound), but split into at least
    # `num_tc` tiles so both v7x TensorCores get work. No activation padding:
    # the last row block may run past M; those rows are masked on store.
    tm = min(_round_up(row_tile, 8), _round_up(-(-M // max(num_tc, 1)), 8))
    tm = max(tm, 8)

    # ---- VMEM budget: shrink tm, then ti, until the tile footprint fits.
    act_b = x2d.dtype.itemsize
    w_b = w1.dtype.itemsize
    budget = max(vmem_phys - 8 * 1024 * 1024, 24 * 1024 * 1024)
    ti_idx = 0
    while (_vmem_estimate(tm, ti_opts[ti_idx], H, act_b, w_b) > budget
           and (tm > 256 or ti_idx + 1 < len(ti_opts))):
        if tm > 256:
            tm = max(256, _round_up(tm // 2, 8))
        else:
            ti_idx += 1
    ti = ti_opts[ti_idx]

    grid_m = pl.cdiv(M, tm)
    grid_k = I_pad // ti
    grid = (grid_m, grid_k)

    vmem_need = _vmem_estimate(tm, ti, H, act_b, w_b)
    vmem_limit = max(32 * 1024 * 1024, int(vmem_need * 1.2) + 4 * 1024 * 1024)
    vmem_limit = min(vmem_limit, vmem_phys - 2 * 1024 * 1024)

    # Advisory cost: weights are re-streamed once per row tile.
    w_stream_bytes = (w1.size + b1.size + w2.size + b2.size) * w_b
    cost = pl.CostEstimate(
        flops=4 * grid_m * tm * H * I_pad,
        transcendentals=grid_m * tm * I_pad,
        bytes_accessed=(
            M * H * act_b                                  # read x
            + M * H * hidden_states.dtype.itemsize         # write out
            + grid_m * w_stream_bytes                      # weight stream per row tile
        ),
    )

    out2d = pl.pallas_call(
        siglip_mlp_kernel,
        out_shape=jax.ShapeDtypeStruct((M, H), hidden_states.dtype),
        grid_spec=pltpu.PrefetchScalarGridSpec(
            num_scalar_prefetch=0,
            grid=grid,
            in_specs=[
                pl.BlockSpec((tm, H), lambda i, k: (i, 0)),   # x rows (k-invariant)
                pl.BlockSpec((H, ti), lambda i, k: (0, k)),   # W1 tile
                pl.BlockSpec((1, ti), lambda i, k: (0, k)),   # b1 tile
                pl.BlockSpec((ti, H), lambda i, k: (k, 0)),   # W2 tile
                pl.BlockSpec((1, H), lambda i, k: (0, 0)),    # b2 (invariant)
            ],
            out_specs=pl.BlockSpec((tm, H), lambda i, k: (i, 0)),
            scratch_shapes=[pltpu.VMEM((tm, H), jnp.float32)],
        ),
        compiler_params=pltpu.CompilerParams(
            dimension_semantics=("parallel", "arbitrary"),
            vmem_limit_bytes=vmem_limit,
        ),
        cost_estimate=cost,
    )(x2d, w1, b1, w2, b2)

    return out2d.reshape(B, S, H)


# --------------------------------------------------------------------------
# Reference & test harness
# --------------------------------------------------------------------------
def siglip_mlp_reference(hidden_states, w1, b1, w2, b2):
    x = hidden_states.astype(jnp.float32)
    h = x @ w1.astype(jnp.float32) + b1.astype(jnp.float32)
    g = _gelu_tanh(h)
    y = g @ w2.astype(jnp.float32) + b2.astype(jnp.float32)
    return y.astype(hidden_states.dtype)


def _make_inputs(key, batch, seq, hidden, inter, dtype=jnp.float32):
    kx, kw1, kb1, kw2, kb2 = jax.random.split(key, 5)
    x = jax.random.normal(kx, (batch, seq, hidden), dtype=dtype)
    # nn.Linear stores weight as (out, in); we keep the transposed (in, out) form.
    w1 = (jax.random.normal(kw1, (hidden, inter), dtype=jnp.float32) * 0.02).astype(dtype)
    b1 = (jax.random.normal(kb1, (1, inter), dtype=jnp.float32) * 0.02).astype(dtype)
    w2 = (jax.random.normal(kw2, (inter, hidden), dtype=jnp.float32) * 0.02).astype(dtype)
    b2 = (jax.random.normal(kb2, (1, hidden), dtype=jnp.float32) * 0.02).astype(dtype)
    return x, w1, b1, w2, b2


if __name__ == "__main__":
    key = jax.random.PRNGKey(0)
    k1, k2, k3 = jax.random.split(key, 3)

    # Test 1: small single-tile path (hidden=32, inter=64 -> padded to 128, M=16).
    x, w1, b1, w2, b2 = _make_inputs(k1, batch=2, seq=8, hidden=32, inter=64)
    out = jax.block_until_ready(siglip_mlp(x, w1, b1, w2, b2))
    ref = siglip_mlp_reference(x, w1, b1, w2, b2)
    assert out.shape == x.shape
    assert jnp.allclose(out, ref, atol=1e-4, rtol=1e-4)

    # Test 2: uneven M (18 rows, tm=8 -> last row block runs past M and is
    # masked on store) and a multi-step intermediate reduction
    # (I=256, ti=128 -> 2 k-steps, exercises acc init/finalize).
    x, w1, b1, w2, b2 = _make_inputs(k2, batch=2, seq=9, hidden=32, inter=256)
    out = jax.block_until_ready(
        siglip_mlp(x, w1, b1, w2, b2, row_tile=8, inter_tile_max=128)
    )
    ref = siglip_mlp_reference(x, w1, b1, w2, b2)
    assert out.shape == x.shape
    assert jnp.allclose(out, ref, atol=1e-4, rtol=1e-4)

    # Test 3: weight padding hoisted out of the per-call path (inter=200 padded
    # once to 256); result must match the reference with the ORIGINAL weights.
    x, w1, b1, w2, b2 = _make_inputs(k3, batch=2, seq=12, hidden=128, inter=200)
    w1p, b1p, w2p = pad_siglip_mlp_weights(w1, b1, w2)
    out = jax.block_until_ready(siglip_mlp(x, w1p, b1p, w2p, b2))
    ref = siglip_mlp_reference(x, w1, b1, w2, b2)
    assert out.shape == x.shape
    assert jnp.allclose(out, ref, atol=1e-4, rtol=1e-4)

    print("KERNEL_OK")
</pallas_src>

<mosaic_0001>
module attributes {stable_mosaic.version = 11 : i64} {
  func.func @siglip_mlp_kernel(%arg0: i32, %arg1: i32, %arg2: memref<16x32xf32, #tpu.memory_space<vmem>>, %arg3: memref<32x128xf32, #tpu.memory_space<vmem>>, %arg4: memref<1x128xf32, #tpu.memory_space<vmem>>, %arg5: memref<128x32xf32, #tpu.memory_space<vmem>>, %arg6: memref<1x32xf32, #tpu.memory_space<vmem>>, %arg7: memref<16x32xf32, #tpu.memory_space<vmem>>, %arg8: memref<16x32xf32, #tpu.memory_space<vmem>>) attributes {dimension_semantics = [#tpu.dimension_semantics<parallel>, #tpu.dimension_semantics<arbitrary>], iteration_bounds = array<i64: 1, 1>, scalar_prefetch = 0 : i64, scratch_operands = 1 : i64, tpu.core_type = #tpu.core_type<tc>, window_params = [{transform_indices = @transform_0, window_bounds = array<i64: 16, 32>}, {transform_indices = @transform_1, window_bounds = array<i64: 32, 128>}, {transform_indices = @transform_2, window_bounds = array<i64: 1, 128>}, {transform_indices = @transform_3, window_bounds = array<i64: 128, 32>}, {pipeline_mode = #tpu.pipeline_mode<synchronous>, transform_indices = @transform_4, window_bounds = array<i64: 1, 32>}, {transform_indices = @transform_5, window_bounds = array<i64: 16, 32>}]} {
    %c0_i32 = arith.constant 0 : i32
    %0 = arith.cmpi eq, %arg1, %c0_i32 : i32
    %1 = arith.extui %0 : i1 to i32
    %c0_i32_0 = arith.constant 0 : i32
    %2 = arith.cmpi ne, %1, %c0_i32_0 : i32
    scf.if %2 {
      %cst_19 = arith.constant 0.000000e+00 : f32
      %30 = vector.broadcast %cst_19 : f32 to vector<16x32xf32>
      %c0_20 = arith.constant 0 : index
      %c0_21 = arith.constant 0 : index
      %31 = vector.load %arg8[%c0_20, %c0_21] : memref<16x32xf32, #tpu.memory_space<vmem>>, vector<16x32xf32>
      tpu.vector_store %arg8[%c0_20, %c0_21], %30 {strides = array<i32>} : memref<16x32xf32, #tpu.memory_space<vmem>>, vector<16x32xf32>,
    } else {
    }
    %c0 = arith.constant 0 : index
    %c0_1 = arith.constant 0 : index
    %3 = vector.load %arg2[%c0, %c0_1] : memref<16x32xf32, #tpu.memory_space<vmem>>, vector<16x32xf32>
    %c0_2 = arith.constant 0 : index
    %c0_3 = arith.constant 0 : index
    %4 = vector.load %arg3[%c0_2, %c0_3] : memref<32x128xf32, #tpu.memory_space<vmem>>, vector<32x128xf32>
    %cst = arith.constant dense<0.000000e+00> : vector<16x128xf32>
    %5 = tpu.matmul %3, %4, %cst {dimension_numbers = #tpu.dot_dimension_numbers<[1], [0], [0], [1], [0, 0, 1, 1], [], []>} : vector<16x32xf32>, vector<32x128xf32>, vector<16x128xf32> -> vector<16x128xf32>
    %c0_4 = arith.constant 0 : index
    %c0_5 = arith.constant 0 : index
    %6 = vector.load %arg4[%c0_4, %c0_5] : memref<1x128xf32, #tpu.memory_space<vmem>>, vector<1x128xf32>
    %7 = vector.broadcast %6 : vector<1x128xf32> to vector<16x128xf32>
    %8 = arith.addf %5, %7 : vector<16x128xf32>
    %cst_6 = arith.constant 5.000000e-01 : f32
    %9 = vector.broadcast %cst_6 : f32 to vector<16x128xf32>
    %10 = arith.mulf %9, %8 : vector<16x128xf32>
    %cst_7 = arith.constant 4.471500e-02 : f32
    %11 = vector.broadcast %cst_7 : f32 to vector<16x128xf32>
    %12 = arith.mulf %11, %8 : vector<16x128xf32>
    %13 = arith.mulf %12, %8 : vector<16x128xf32>
    %14 = arith.mulf %13, %8 : vector<16x128xf32>
    %15 = arith.addf %8, %14 : vector<16x128xf32>
    %cst_8 = arith.constant 0.797884583 : f32
    %16 = vector.broadcast %cst_8 : f32 to vector<16x128xf32>
    %17 = arith.mulf %16, %15 : vector<16x128xf32>
    %18 = math.tanh %17 : vector<16x128xf32>
    %cst_9 = arith.constant 1.000000e+00 : f32
    %19 = vector.broadcast %cst_9 : f32 to vector<16x128xf32>
    %20 = arith.addf %19, %18 : vector<16x128xf32>
    %21 = arith.mulf %10, %20 : vector<16x128xf32>
    %c0_10 = arith.constant 0 : index
    %c0_11 = arith.constant 0 : index
    %22 = vector.load %arg8[%c0_10, %c0_11] : memref<16x32xf32, #tpu.memory_space<vmem>>, vector<16x32xf32>
    %c0_12 = arith.constant 0 : index
    %c0_13 = arith.constant 0 : index
    %23 = vector.load %arg5[%c0_12, %c0_13] : memref<128x32xf32, #tpu.memory_space<vmem>>, vector<128x32xf32>
    %cst_14 = arith.constant dense<0.000000e+00> : vector<16x32xf32>
    %24 = tpu.matmul %21, %23, %cst_14 {dimension_numbers = #tpu.dot_dimension_numbers<[1], [0], [0], [1], [0, 0, 1, 1], [], []>} : vector<16x128xf32>, vector<128x32xf32>, vector<16x32xf32> -> vector<16x32xf32>
    %25 = arith.addf %22, %24 : vector<16x32xf32>
    %c0_15 = arith.constant 0 : index
    %c0_16 = arith.constant 0 : index
    %26 = vector.load %arg8[%c0_15, %c0_16] : memref<16x32xf32, #tpu.memory_space<vmem>>, vector<16x32xf32>
    tpu.vector_store %arg8[%c0_15, %c0_16], %25 {strides = array<i32>} : memref<16x32xf32, #tpu.memory_space<vmem>>, vector<16x32xf32>,
    %c0_i32_17 = arith.constant 0 : i32
    %27 = arith.cmpi eq, %arg1, %c0_i32_17 : i32
    %28 = arith.extui %27 : i1 to i32
    %c0_i32_18 = arith.constant 0 : i32
    %29 = arith.cmpi ne, %28, %c0_i32_18 : i32
    scf.if %29 {
      %c0_19 = arith.constant 0 : index
      %c0_20 = arith.constant 0 : index
      %30 = vector.load %arg8[%c0_19, %c0_20] : memref<16x32xf32, #tpu.memory_space<vmem>>, vector<16x32xf32>
      %c0_21 = arith.constant 0 : index
      %c0_22 = arith.constant 0 : index
      %31 = vector.load %arg6[%c0_21, %c0_22] : memref<1x32xf32, #tpu.memory_space<vmem>>, vector<1x32xf32>
      %32 = vector.broadcast %31 : vector<1x32xf32> to vector<16x32xf32>
      %33 = arith.addf %30, %32 : vector<16x32xf32>
      %c0_23 = arith.constant 0 : index
      %c0_24 = arith.constant 0 : index
      %34 = vector.load %arg7[%c0_23, %c0_24] : memref<16x32xf32, #tpu.memory_space<vmem>>, vector<16x32xf32>
      tpu.vector_store %arg7[%c0_23, %c0_24], %33 {strides = array<i32>} : memref<16x32xf32, #tpu.memory_space<vmem>>, vector<16x32xf32>,
    } else {
    }
    return
  }
  func.func @transform_0(%arg0: i32, %arg1: i32) -> (i32, i32) {
    %c0_i32 = arith.constant 0 : i32
    %c0_i32_0 = arith.constant 0 : i32
    return %arg0, %c0_i32 : i32, i32
  }
  func.func @transform_1(%arg0: i32, %arg1: i32) -> (i32, i32) {
    %c0_i32 = arith.constant 0 : i32
    %c0_i32_0 = arith.constant 0 : i32
    return %c0_i32, %arg1 : i32, i32
  }
  func.func @transform_2(%arg0: i32, %arg1: i32) -> (i32, i32) {
    %c0_i32 = arith.constant 0 : i32
    %c0_i32_0 = arith.constant 0 : i32
    return %c0_i32, %arg1 : i32, i32
  }
  func.func @transform_3(%arg0: i32, %arg1: i32) -> (i32, i32) {
    %c0_i32 = arith.constant 0 : i32
    %c0_i32_0 = arith.constant 0 : i32
    return %arg1, %c0_i32 : i32, i32
  }
  func.func @transform_4(%arg0: i32, %arg1: i32) -> (i32, i32) {
    %c0_i32 = arith.constant 0 : i32
    %c0_i32_0 = arith.constant 0 : i32
    %c0_i32_1 = arith.constant 0 : i32
    return %c0_i32, %c0_i32_0 : i32, i32
  }
  func.func @transform_5(%arg0: i32, %arg1: i32) -> (i32, i32) {
    %c0_i32 = arith.constant 0 : i32
    %c0_i32_0 = arith.constant 0 : i32
    return %arg0, %c0_i32 : i32, i32
  }
}

</mosaic_0001>

<bundles_post_ra>
// kernel: tpu_custom_call.1
= control target key start
LH: loop header
LB: loop body
LE: loop exit
PB: predicated region body
PF: predicated region fallthrough
CT: control target
= control target key end

     0   :  { %s333_s0 = inlined_call_operand.vmem [shape: f32[16,32], index: 0, kind: input, shape index: {}]   ;;  %s334_s1 = inlined_call_operand.vmem [shape: f32[32,128], index: 1, kind: input, shape index: {}]   ;;  %s335_s2 = inlined_call_operand.vmem [shape: f32[1,128], index: 2, kind: input, shape index: {}]   ;;  %s336_s3 = inlined_call_operand.vmem [shape: f32[128,32], index: 3, kind: input, shape index: {}]   ;;  %s337_s4 = inlined_call_operand.vmem [shape: f32[1,32], index: 4, kind: input, shape index: {}]   ;;  %s338_s5 = inlined_call_operand.hbm [shape: f32[16,32], index: 5, kind: output, shape index: {}]  }
   0x1   :  { %v33_v0 = vld [vmem:[%s334_s1 + $0x18] sm:$0xff]  ;;  %v32_v1 = vld [vmem:[%s334_s1 + $0x10] sm:$0xff]  ;;  %v31_v2 = vld [vmem:[%s334_s1 + $0x8] sm:$0xff] }
   0x2   :  { %57 = vmatpush.msra.mxu0 %v33_v0  ;;  %v103_v3 = vld [vmem:[%s336_s3 + $0x78] sm:$0xff]  ;;  %v102_v4 = vld [vmem:[%s336_s3 + $0x70] sm:$0xff]  ;;  %v30_v5 = vld [vmem:[%s334_s1] sm:$0xff] }
   0x3   :  { %104 = vmatpush.msra.mxu1 %v103_v3  ;;  %v101_v6 = vld [vmem:[%s336_s3 + $0x68] sm:$0xff]  ;;  %164 = vmatpush.msra.mxu2 %v103_v3 }
   0x4   :  { %58 = vmatpush.msra.mxu0 %v32_v1 }
   0x5   :  { %10 = vsyncpa [#allocation4], 0  ;;  %vm25_vm0 = vcmask 261120   ;;  %v28_v7 = vld [vmem:[%s333_s0] sm:$0xff]  ;;  %105 = vmatpush.msra.mxu1 %v102_v4  ;;  %165 = vmatpush.msra.mxu2 %v102_v4  ;;  %v29_v9 = vld [vmem:[%s333_s0 + $0x8] sm:$0xff]  ;;  %v216_v25 = vmov 0.0  }
   0x6   :  { %59 = vmatpush.msra.mxu0 %v31_v2  ;;  %v100_v8 = vld [vmem:[%s336_s3 + $0x60] sm:$0xff]  ;;  %v99_v10 = vld [vmem:[%s336_s3 + $0x58] sm:$0xff]  ;;  %v98_v11 = vld [vmem:[%s336_s3 + $0x50] sm:$0xff]  ;;  %26 = vst.msk [vmem:[#allocation2] sm:$0xff] %vm25_vm0, %v216_v25  ;;  %s217_s11 = smov [#allocation3]   ;;  %s150_s15 = sshll.u32 %s338_s5, 4  ;;  %s151_s15 = int_to_ptr.hbm [resolvable:$true] %s150_s15 }
   0x7   :  { %106 = vmatpush.msra.mxu1 %v101_v6  ;;  %166 = vmatpush.msra.mxu2 %v101_v6  ;;  %v97_v12 = vld [vmem:[%s336_s3 + $0x48] sm:$0xff]  ;;  %v96_v13 = vld [vmem:[%s336_s3 + $0x40] sm:$0xff]  ;;  %v95_v14 = vld [vmem:[%s336_s3 + $0x38] sm:$0xff]  ;;  %27 = vst.msk [vmem:[#allocation2 + $0x8] sm:$0xff] %vm25_vm0, %v216_v25  ;;  %s148_s12 = sshll.u32 %s217_s11, 4  ;;  %s219_s16 = smov 8   ;;  %s149_s12 = int_to_ptr.vmem [resolvable:$true] %s148_s12 }
   0x8   :  { %60 = vmatpush.msra.mxu0 %v30_v5  ;;  %v94_v15 = vld [vmem:[%s336_s3 + $0x30] sm:$0xff]  ;;  %v93_v16 = vld [vmem:[%s336_s3 + $0x28] sm:$0xff]  ;;  %v92_v17 = vld [vmem:[%s336_s3 + $0x20] sm:$0xff] }
   0x9   :  { %162 = vmatmul.msk.f32.vlgmr.msra.gmra.mxu0 %vm25_vm0, %v28_v7  ;;  %107 = vmatpush.msra.mxu1 %v100_v8  ;;  %v91_v18 = vld [vmem:[%s336_s3 + $0x18] sm:$0xff]  ;;  %v90_v19 = vld [vmem:[%s336_s3 + $0x10] sm:$0xff]  ;;  %v89_v20 = vld [vmem:[%s336_s3 + $0x8] sm:$0xff] }
   0xa   :  { %167 = vmatpush.msra.mxu2 %v100_v8  ;;  %v88_v21 = vld [vmem:[%s336_s3] sm:$0xff] }
   0xb   :  { %108 = vmatpush.msra.mxu1 %v99_v10  ;;  %v184_v22 = vld [vmem:[%s335_s2] ss:$0 sm:$0xff] }
   0xc   :  { %168 = vmatpush.msra.mxu2 %v99_v10  ;;  %v185_v49 = vld [vmem:[%s337_s4] ss:$0 sm:$0xff]  ;;  %s218_s4 = smov 128  }
   0xd   :  { %109 = vmatpush.msra.mxu1 %v98_v11  ;;  %v86_v46 = vld [vmem:[#allocation2] sm:$0xff] }
   0xe   :  { %169 = vmatpush.msra.mxu2 %v98_v11  ;;  %v87_v52 = vld [vmem:[#allocation2 + $0x8] sm:$0xff] }
   0xf   :  { %110 = vmatpush.msra.mxu1 %v97_v12 }
  0x10   :  { %170 = vmatpush.msra.mxu2 %v97_v12 }
  0x11   :  { %163 = vmatmul.msk.f32.gmra.mxu0 %vm25_vm0, %v29_v9  ;;  %111 = vmatpush.msra.mxu1 %v96_v13 }
  0x12   :  { %171 = vmatpush.msra.mxu2 %v96_v13 }
  0x13   :  { %112 = vmatpush.msra.mxu1 %v95_v14 }
  0x14   :  { %172 = vmatpush.msra.mxu2 %v95_v14 }
  0x15   :  { %113 = vmatpush.msra.mxu1 %v94_v15 }
  0x16   :  { %173 = vmatpush.msra.mxu2 %v94_v15 }
  0x17   :  { %114 = vmatpush.msra.mxu1 %v93_v16 }
  0x18   :  { %174 = vmatpush.msra.mxu2 %v93_v16 }
  0x19   :  { %115 = vmatpush.msra.mxu1 %v92_v17 }
  0x1a   :  { %175 = vmatpush.msra.mxu2 %v92_v17 }
  0x1b   :  { %116 = vmatpush.msra.mxu1 %v91_v18 }
  0x1c   :  { %176 = vmatpush.msra.mxu2 %v91_v18 }
  0x1d   :  { %117 = vmatpush.msra.mxu1 %v90_v19 }
  0x1e   :  { %177 = vmatpush.msra.mxu2 %v90_v19 }
  0x1f   :  { %118 = vmatpush.msra.mxu1 %v89_v20 }
  0x20   :  { %178 = vmatpush.msra.mxu2 %v89_v20 }
  0x21   :  { %119 = vmatpush.msra.mxu1 %v88_v21 }
  0x22   :  { %179 = vmatpush.msra.mxu2 %v88_v21 }
  0x86   :  { %v62_v23 = vpop.f32.mrf.mxu0 }
  0x87   :  { %v63_v24 = vadd.f32 %v184_v22, %v62_v23 }
  0x89   :  { %v70_v26 = vmul.f32 0.044715, %v63_v24  ;;  %v68_v39 = vmul.f32 0.5, %v63_v24 }
  0x8b   :  { %v72_v27 = vmul.f32 %v70_v26, %v63_v24 }
  0x8d   :  { %v74_v28 = vmul.f32 %v72_v27, %v63_v24 }
  0x8e   :  { %v65_v29 = vpop.f32.mrf.mxu0 }
  0x8f   :  { %v66_v30 = vadd.f32 %v184_v22, %v65_v29  ;;  %v76_v31 = vadd.f32 %v74_v28, %v63_v24 }
  0x91   :  { %v78_v32 = vmul.f32 0.7978846, %v76_v31  ;;  %v71_v33 = vmul.f32 0.044715, %v66_v30  ;;  %v69_v43 = vmul.f32 0.5, %v66_v30 }
  0x93   :  { %186 = vtanh.f32 %v78_v32  ;;  %v73_v34 = vmul.f32 %v71_v33, %v66_v30 }
  0x95   :  { %v75_v35 = vmul.f32 %v73_v34, %v66_v30 }
  0x97   :  { %v77_v36 = vadd.f32 %v75_v35, %v66_v30 }
  0x99   :  { %v187_v37 = vpop.eup %186  ;;  %v79_v38 = vmul.f32 0.7978846, %v77_v36 }
  0x9a   :  { %v82_v40 = vadd.f32 1.0, %v187_v37 }
  0x9b   :  { %188 = vtanh.f32 %v79_v38 }
  0x9c   :  { %v84_v41 = vmul.f32 %v82_v40, %v68_v39 }
  0x9e   :  { %120 = vmatmul.f32.vlgmr.msra.gmra.mxu1 %v84_v41 }
  0xa1   :  { %v189_v42 = vpop.eup %188 }
  0xa2   :  { %v83_v44 = vadd.f32 1.0, %v189_v42 }
  0xa4   :  { %v85_v45 = vmul.f32 %v83_v44, %v69_v43 }
  0xa6   :  { %123 = vmatmul.f32.vlgmr.msra.gmra.mxu2 %v85_v45 }
 0x11b   :  { %v121_v47 = vpop.f32.mrf.mxu1 }
 0x11c   :  { %v127_v48 = vadd.f32 %v121_v47, %v86_v46 }
 0x11e   :  { %129 = vst.msk [vmem:[#allocation2] sm:$0xff] %vm25_vm0, %v127_v48 }
 0x125   :  { %v134_v50 = vld [vmem:[#allocation2] sm:$0xff] }
 0x126   :  { %v140_v51 = vadd.f32 %v185_v49, %v134_v50 }
 0x128   :  { %142 = vst.msk [vmem:[#allocation3] sm:$0xff] %vm25_vm0, %v140_v51 }
 0x129   :  { %v124_v53 = vpop.f32.mrf.mxu2 }
 0x12a   :  { %v128_v54 = vadd.f32 %v124_v53, %v87_v52 }
 0x12c   :  { %130 = vst.msk [vmem:[#allocation2 + $0x8] sm:$0xff] %vm25_vm0, %v128_v54 }
 0x133   :  { %v135_v55 = vld [vmem:[#allocation2 + $0x8] sm:$0xff] }
 0x134   :  { %v141_v56 = vadd.f32 %v185_v49, %v135_v55 }
 0x136   :  { %143 = vst.msk [vmem:[#allocation3 + $0x8] sm:$0xff] %vm25_vm0, %v141_v56 }
 0x137   :  { %156 = dma.vmem_to_hbm [thread:$0]  %s149_s12, 256, %s151_s15, [#allocation4], %s218_s4, %s218_s4, %s219_s16  }
 0x138   :  { %214 = dma.done.wait [#allocation4], 256  }
 0x139   :  { %215 = vsyncadd [#allocation4], 4294967040 }
 0x13a   :  { %161 = vsyncpa [#allocation4], 1 }

</bundles_post_ra>
